<compile_context>
chip_gen: v5e
topology: v5e:2x2
jax: 0.10.0
libtpu: 0.0.40
codegen_flags: <defaults>
</compile_context>

<pallas_src>
import functools

import jax
import jax.numpy as jnp
from jax.experimental import pallas as pl
from jax.experimental.pallas import tpu as pltpu


def _round_up(x, m):
    return (x + m - 1) // m * m


def _appnp_kernel(x_ref, w1_ref, b1_ref, w2_ref, b2_ref, adj_ref, o_ref,
                  ah0_ref, z0_ref, z1_ref, *, k, alpha, row_tile):
    t = pl.program_id(0)                    # power-iteration step (outer)
    r = pl.program_id(1)                    # adjacency row-stripe (inner)
    row0 = pl.multiple_of(r * row_tile, row_tile)

    # ---- phase 0: MLP, computed once, results parked in VMEM scratch ----
    @pl.when(jnp.logical_and(t == 0, r == 0))
    def _mlp():
        h = jnp.dot(x_ref[...], w1_ref[...],
                    preferred_element_type=jnp.float32)          # bf16 in, f32 acc
        h = jnp.maximum(h + b1_ref[...], 0.0)                    # relu (f32 VPU)
        h0 = jnp.dot(h.astype(jnp.bfloat16), w2_ref[...],
                     preferred_element_type=jnp.float32) + b2_ref[...]
        z0_ref[...] = h0                                         # z_0 = h0 (f32 carry)
        ah0_ref[...] = alpha * h0                                # hoisted alpha * h0

    # ---- propagation row-stripe:  z_new[rows] = (1-a)*A[rows,:]@z_old + a*h0[rows]
    adj_rows = adj_ref[...]                                      # (row_tile, NP) bf16

    def step(src_ref, dst_ref):
        az = jnp.dot(adj_rows, src_ref[...].astype(jnp.bfloat16),
                     preferred_element_type=jnp.float32)         # MXU, f32 acc
        z_new = (1.0 - alpha) * az + ah0_ref[pl.ds(row0, row_tile), :]
        dst_ref[pl.ds(row0, row_tile), :] = z_new

        @pl.when(t == k - 1)                                     # lane-dense final store
        def _():
            o_ref[pl.ds(row0, row_tile), :] = z_new.astype(o_ref.dtype)

    # ping-pong the f32 carry between the two scratch buffers across power steps
    @pl.when(t % 2 == 0)
    def _even():
        step(z0_ref, z1_ref)

    @pl.when(t % 2 == 1)
    def _odd():
        step(z1_ref, z0_ref)


def appnp_forward(x, w1, b1, w2, b2, adj_norm, *, k, alpha, row_tile=256):
    """x: [N, in], w1: [in, H], b1: [1, H], w2: [H, C], b2: [1, C],
    adj_norm: [N, N]. Returns logits [N, C] (float32)."""
    assert k >= 1, "APPNP requires at least one propagation step"
    n, _ = x.shape
    h_feats = w1.shape[1]
    c = w2.shape[1]

    row_tile = min(row_tile, _round_up(n, 8))
    np_ = _round_up(n, row_tile)                 # padded node count
    cp = _round_up(max(c, 128), 128)             # lane-dense class width

    # Cast MXU operands to bf16 in the wrapper (halves adj HBM traffic); pad
    # rows to np_ and classes to cp with zeros (zero pad cols stay zero).
    xp = jnp.zeros((np_, x.shape[1]), jnp.bfloat16).at[:n, :].set(x.astype(jnp.bfloat16))
    adjp = jnp.zeros((np_, np_), jnp.bfloat16).at[:n, :n].set(adj_norm.astype(jnp.bfloat16))
    w1b = w1.astype(jnp.bfloat16)
    b1f = b1.reshape(1, h_feats).astype(jnp.float32)
    w2p = jnp.zeros((h_feats, cp), jnp.bfloat16).at[:, :c].set(w2.astype(jnp.bfloat16))
    b2p = jnp.zeros((1, cp), jnp.float32).at[:, :c].set(b2.reshape(1, c).astype(jnp.float32))

    grid = (k, np_ // row_tile)
    kernel = functools.partial(_appnp_kernel, k=k, alpha=float(alpha),
                               row_tile=row_tile)

    def const_spec(shape):
        return pl.BlockSpec(shape, lambda t, r: (0,) * len(shape))

    out = pl.pallas_call(
        kernel,
        out_shape=jax.ShapeDtypeStruct((np_, cp), jnp.float32),
        grid=grid,
        in_specs=[
            const_spec(xp.shape),                                   # x     (resident)
            const_spec(w1b.shape),                                  # W1    (resident)
            const_spec(b1f.shape),                                  # b1    (resident)
            const_spec(w2p.shape),                                  # W2    (resident)
            const_spec(b2p.shape),                                  # b2    (resident)
            pl.BlockSpec((row_tile, np_), lambda t, r: (r, 0)),     # adj row stripes, streamed
        ],
        out_specs=const_spec((np_, cp)),        # resident; single writeback at grid end
        scratch_shapes=[
            pltpu.VMEM((np_, cp), jnp.float32),   # alpha * h0 (hoisted)
            pltpu.VMEM((np_, cp), jnp.float32),   # z ping (f32 carry)
            pltpu.VMEM((np_, cp), jnp.float32),   # z pong (f32 carry)
        ],
        compiler_params=pltpu.CompilerParams(
            dimension_semantics=("arbitrary", "arbitrary")),
    )(xp, w1b, b1f, w2p, b2p, adjp)

    return out[:n, :c]


def _linear_init(key, fan_in, fan_out):
    """Deterministic init mimicking torch.nn.Linear.reset_parameters."""
    kw, kb = jax.random.split(key)
    bound_w = jnp.sqrt(6.0 / fan_in)          # kaiming_uniform with a=sqrt(5)
    w = jax.random.uniform(kw, (fan_in, fan_out), jnp.float32,
                           minval=-bound_w, maxval=bound_w)
    bound_b = 1.0 / jnp.sqrt(fan_in)
    b = jax.random.uniform(kb, (1, fan_out), jnp.float32,
                           minval=-bound_b, maxval=bound_b)
    return w, b


def _make_graph(key, n):
    """Random undirected graph with self loops, symmetrically normalized."""
    a = (jax.random.uniform(key, (n, n)) < 0.05).astype(jnp.float32)
    a = jnp.maximum(a, a.T)
    a = jnp.maximum(a, jnp.eye(n, dtype=jnp.float32))
    deg = a.sum(axis=1)
    inv_sqrt = 1.0 / jnp.sqrt(jnp.clip(deg, 1.0, None))
    return inv_sqrt[:, None] * a * inv_sqrt[None, :]


if __name__ == "__main__":
    # Small, module-consistent shapes.
    N = 128            # number of graph nodes
    IN_SIZE = 32       # input feature size
    H_FEATS = 64       # args.h_feats
    NUM_CLASSES = 8    # num_classes
    K = 10             # args.k
    ALPHA = 0.1        # args.alpha

    root = jax.random.PRNGKey(0)
    k_x, k_g, k_l1, k_l2 = jax.random.split(root, 4)

    x = jax.random.normal(k_x, (N, IN_SIZE), jnp.float32)
    adj_norm = _make_graph(k_g, N)

    w1, b1 = _linear_init(k_l1, IN_SIZE, H_FEATS)
    w2, b2 = _linear_init(k_l2, H_FEATS, NUM_CLASSES)

    fwd = jax.jit(functools.partial(appnp_forward, k=K, alpha=ALPHA))
    out = jax.block_until_ready(fwd(x, w1, b1, w2, b2, adj_norm))

    # Reference with the same mixed precision (bf16 MXU operands, f32 accum).
    xb, w1b, w2b = (a.astype(jnp.bfloat16) for a in (x, w1, w2))
    adjb = adj_norm.astype(jnp.bfloat16)
    h_ref = jnp.maximum(jnp.dot(xb, w1b, preferred_element_type=jnp.float32) + b1, 0.0)
    h0_ref = jnp.dot(h_ref.astype(jnp.bfloat16), w2b,
                     preferred_element_type=jnp.float32) + b2
    z_ref = h0_ref
    for _ in range(K):
        az = jnp.dot(adjb, z_ref.astype(jnp.bfloat16),
                     preferred_element_type=jnp.float32)
        z_ref = (1.0 - ALPHA) * az + ALPHA * h0_ref

    assert out.shape == (N, NUM_CLASSES)
    assert jnp.allclose(out, z_ref, atol=5e-3, rtol=5e-3), (
        float(jnp.max(jnp.abs(out - z_ref))))

    print("KERNEL_OK")
</pallas_src>

<mosaic_0001>
module attributes {stable_mosaic.version = 11 : i64} {
  func.func @_appnp_kernel(%arg0: i32, %arg1: i32, %arg2: memref<128x32xbf16, #tpu.memory_space<vmem>>, %arg3: memref<32x64xbf16, #tpu.memory_space<vmem>>, %arg4: memref<1x64xf32, #tpu.memory_space<vmem>>, %arg5: memref<64x128xbf16, #tpu.memory_space<vmem>>, %arg6: memref<1x128xf32, #tpu.memory_space<vmem>>, %arg7: memref<128x128xbf16, #tpu.memory_space<vmem>>, %arg8: memref<128x128xf32, #tpu.memory_space<vmem>>, %arg9: memref<128x128xf32, #tpu.memory_space<vmem>>, %arg10: memref<128x128xf32, #tpu.memory_space<vmem>>, %arg11: memref<128x128xf32, #tpu.memory_space<vmem>>) attributes {dimension_semantics = [#tpu.dimension_semantics<arbitrary>, #tpu.dimension_semantics<arbitrary>], iteration_bounds = array<i64: 10, 1>, scalar_prefetch = 0 : i64, scratch_operands = 3 : i64, tpu.core_type = #tpu.core_type<tc>, window_params = [{pipeline_mode = #tpu.pipeline_mode<synchronous>, transform_indices = @transform_0, window_bounds = array<i64: 128, 32>}, {pipeline_mode = #tpu.pipeline_mode<synchronous>, transform_indices = @transform_1, window_bounds = array<i64: 32, 64>}, {pipeline_mode = #tpu.pipeline_mode<synchronous>, transform_indices = @transform_2, window_bounds = array<i64: 1, 64>}, {pipeline_mode = #tpu.pipeline_mode<synchronous>, transform_indices = @transform_3, window_bounds = array<i64: 64, 128>}, {pipeline_mode = #tpu.pipeline_mode<synchronous>, transform_indices = @transform_4, window_bounds = array<i64: 1, 128>}, {transform_indices = @transform_5, window_bounds = array<i64: 128, 128>}, {pipeline_mode = #tpu.pipeline_mode<synchronous>, transform_indices = @transform_6, window_bounds = array<i64: 128, 128>}]} {
    %c128_i32 = arith.constant 128 : i32
    %0 = arith.muli %arg1, %c128_i32 : i32
    %1 = tpu.assume_multiple %0, 128 : i32
    %c0_i32 = arith.constant 0 : i32
    %2 = arith.cmpi eq, %arg0, %c0_i32 : i32
    %c0_i32_0 = arith.constant 0 : i32
    %3 = arith.cmpi eq, %arg1, %c0_i32_0 : i32
    %4 = arith.andi %2, %3 : i1
    %5 = arith.extui %4 : i1 to i32
    %c0_i32_1 = arith.constant 0 : i32
    %6 = arith.cmpi ne, %5, %c0_i32_1 : i32
    scf.if %6 {
      %c0_17 = arith.constant 0 : index
      %c0_18 = arith.constant 0 : index
      %34 = vector.load %arg2[%c0_17, %c0_18] : memref<128x32xbf16, #tpu.memory_space<vmem>>, vector<128x32xbf16>
      %c0_19 = arith.constant 0 : index
      %c0_20 = arith.constant 0 : index
      %35 = vector.load %arg3[%c0_19, %c0_20] : memref<32x64xbf16, #tpu.memory_space<vmem>>, vector<32x64xbf16>
      %cst = arith.constant dense<0.000000e+00> : vector<128x64xf32>
      %36 = tpu.matmul %34, %35, %cst {dimension_numbers = #tpu.dot_dimension_numbers<[1], [0], [0], [1], [0, 0, 1, 1], [], []>} : vector<128x32xbf16>, vector<32x64xbf16>, vector<128x64xf32> -> vector<128x64xf32>
      %c0_21 = arith.constant 0 : index
      %c0_22 = arith.constant 0 : index
      %37 = vector.load %arg4[%c0_21, %c0_22] : memref<1x64xf32, #tpu.memory_space<vmem>>, vector<1x64xf32>
      %38 = vector.broadcast %37 : vector<1x64xf32> to vector<128x64xf32>
      %39 = arith.addf %36, %38 : vector<128x64xf32>
      %cst_23 = arith.constant 0.000000e+00 : f32
      %40 = vector.broadcast %cst_23 : f32 to vector<128x64xf32>
      %41 = arith.maximumf %39, %40 : vector<128x64xf32>
      %42 = arith.truncf %41 : vector<128x64xf32> to vector<128x64xbf16>
      %c0_24 = arith.constant 0 : index
      %c0_25 = arith.constant 0 : index
      %43 = vector.load %arg5[%c0_24, %c0_25] : memref<64x128xbf16, #tpu.memory_space<vmem>>, vector<64x128xbf16>
      %cst_26 = arith.constant dense<0.000000e+00> : vector<128x128xf32>
      %44 = tpu.matmul %42, %43, %cst_26 {dimension_numbers = #tpu.dot_dimension_numbers<[1], [0], [0], [1], [0, 0, 1, 1], [], []>} : vector<128x64xbf16>, vector<64x128xbf16>, vector<128x128xf32> -> vector<128x128xf32>
      %c0_27 = arith.constant 0 : index
      %c0_28 = arith.constant 0 : index
      %45 = vector.load %arg6[%c0_27, %c0_28] : memref<1x128xf32, #tpu.memory_space<vmem>>, vector<1x128xf32>
      %46 = vector.broadcast %45 : vector<1x128xf32> to vector<128x128xf32>
      %47 = arith.addf %44, %46 : vector<128x128xf32>
      %c0_29 = arith.constant 0 : index
      %c0_30 = arith.constant 0 : index
      %48 = vector.load %arg10[%c0_29, %c0_30] : memref<128x128xf32, #tpu.memory_space<vmem>>, vector<128x128xf32>
      tpu.vector_store %arg10[%c0_29, %c0_30], %47 {strides = array<i32>} : memref<128x128xf32, #tpu.memory_space<vmem>>, vector<128x128xf32>,
      %cst_31 = arith.constant 1.000000e-01 : f32
      %49 = vector.broadcast %cst_31 : f32 to vector<128x128xf32>
      %50 = arith.mulf %49, %47 : vector<128x128xf32>
      %c0_32 = arith.constant 0 : index
      %c0_33 = arith.constant 0 : index
      %51 = vector.load %arg9[%c0_32, %c0_33] : memref<128x128xf32, #tpu.memory_space<vmem>>, vector<128x128xf32>
      tpu.vector_store %arg9[%c0_32, %c0_33], %50 {strides = array<i32>} : memref<128x128xf32, #tpu.memory_space<vmem>>, vector<128x128xf32>,
    } else {
    }
    %c0 = arith.constant 0 : index
    %c0_2 = arith.constant 0 : index
    %7 = vector.load %arg7[%c0, %c0_2] : memref<128x128xbf16, #tpu.memory_space<vmem>>, vector<128x128xbf16>
    %c2_i32 = arith.constant 2 : i32
    %c0_i32_3 = arith.constant 0 : i32
    %8 = arith.cmpi eq, %c2_i32, %c0_i32_3 : i32
    %c1_i32 = arith.constant 1 : i32
    %9 = arith.select %8, %c1_i32, %c2_i32 : i32
    %10 = arith.remsi %arg0, %9 : i32
    %c0_i32_4 = arith.constant 0 : i32
    %11 = arith.cmpi ne, %10, %c0_i32_4 : i32
    %c0_i32_5 = arith.constant 0 : i32
    %12 = arith.cmpi slt, %10, %c0_i32_5 : i32
    %c0_i32_6 = arith.constant 0 : i32
    %13 = arith.cmpi slt, %9, %c0_i32_6 : i32
    %14 = arith.xori %12, %13 : i1
    %15 = arith.andi %14, %11 : i1
    %16 = arith.addi %10, %9 : i32
    %17 = arith.select %15, %16, %10 : i32
    %c0_i32_7 = arith.constant 0 : i32
    %18 = arith.cmpi eq, %17, %c0_i32_7 : i32
    %19 = arith.extui %18 : i1 to i32
    %c0_i32_8 = arith.constant 0 : i32
    %20 = arith.cmpi ne, %19, %c0_i32_8 : i32
    scf.if %20 {
      %c0_17 = arith.constant 0 : index
      %c0_18 = arith.constant 0 : index
      %34 = vector.load %arg10[%c0_17, %c0_18] : memref<128x128xf32, #tpu.memory_space<vmem>>, vector<128x128xf32>
      %35 = arith.truncf %34 : vector<128x128xf32> to vector<128x128xbf16>
      %cst = arith.constant dense<0.000000e+00> : vector<128x128xf32>
      %36 = tpu.matmul %7, %35, %cst {dimension_numbers = #tpu.dot_dimension_numbers<[1], [0], [0], [1], [0, 0, 1, 1], [], []>} : vector<128x128xbf16>, vector<128x128xbf16>, vector<128x128xf32> -> vector<128x128xf32>
      %cst_19 = arith.constant 0.899999976 : f32
      %37 = vector.broadcast %cst_19 : f32 to vector<128x128xf32>
      %38 = arith.mulf %37, %36 : vector<128x128xf32>
      %39 = arith.index_cast %1 : i32 to index
      %c0_20 = arith.constant 0 : index
      %40 = vector.load %arg9[%39, %c0_20] : memref<128x128xf32, #tpu.memory_space<vmem>>, vector<128x128xf32>
      %41 = arith.addf %38, %40 : vector<128x128xf32>
      %42 = arith.index_cast %1 : i32 to index
      %c0_21 = arith.constant 0 : index
      %43 = vector.load %arg11[%42, %c0_21] : memref<128x128xf32, #tpu.memory_space<vmem>>, vector<128x128xf32>
      tpu.vector_store %arg11[%42, %c0_21], %41 {strides = array<i32>} : memref<128x128xf32, #tpu.memory_space<vmem>>, vector<128x128xf32>,
      %c9_i32 = arith.constant 9 : i32
      %44 = arith.cmpi eq, %arg0, %c9_i32 : i32
      %45 = arith.extui %44 : i1 to i32
      %c0_i32_22 = arith.constant 0 : i32
      %46 = arith.cmpi ne, %45, %c0_i32_22 : i32
      scf.if %46 {
        %47 = arith.index_cast %1 : i32 to index
        %c0_23 = arith.constant 0 : index
        %48 = vector.load %arg8[%47, %c0_23] : memref<128x128xf32, #tpu.memory_space<vmem>>, vector<128x128xf32>
        tpu.vector_store %arg8[%47, %c0_23], %41 {strides = array<i32>} : memref<128x128xf32, #tpu.memory_space<vmem>>, vector<128x128xf32>,
      } else {
      }
    } else {
    }
    %c2_i32_9 = arith.constant 2 : i32
    %c0_i32_10 = arith.constant 0 : i32
    %21 = arith.cmpi eq, %c2_i32_9, %c0_i32_10 : i32
    %c1_i32_11 = arith.constant 1 : i32
    %22 = arith.select %21, %c1_i32_11, %c2_i32_9 : i32
    %23 = arith.remsi %arg0, %22 : i32
    %c0_i32_12 = arith.constant 0 : i32
    %24 = arith.cmpi ne, %23, %c0_i32_12 : i32
    %c0_i32_13 = arith.constant 0 : i32
    %25 = arith.cmpi slt, %23, %c0_i32_13 : i32
    %c0_i32_14 = arith.constant 0 : i32
    %26 = arith.cmpi slt, %22, %c0_i32_14 : i32
    %27 = arith.xori %25, %26 : i1
    %28 = arith.andi %27, %24 : i1
    %29 = arith.addi %23, %22 : i32
    %30 = arith.select %28, %29, %23 : i32
    %c1_i32_15 = arith.constant 1 : i32
    %31 = arith.cmpi eq, %30, %c1_i32_15 : i32
    %32 = arith.extui %31 : i1 to i32
    %c0_i32_16 = arith.constant 0 : i32
    %33 = arith.cmpi ne, %32, %c0_i32_16 : i32
    scf.if %33 {
      %c0_17 = arith.constant 0 : index
      %c0_18 = arith.constant 0 : index
      %34 = vector.load %arg11[%c0_17, %c0_18] : memref<128x128xf32, #tpu.memory_space<vmem>>, vector<128x128xf32>
      %35 = arith.truncf %34 : vector<128x128xf32> to vector<128x128xbf16>
      %cst = arith.constant dense<0.000000e+00> : vector<128x128xf32>
      %36 = tpu.matmul %7, %35, %cst {dimension_numbers = #tpu.dot_dimension_numbers<[1], [0], [0], [1], [0, 0, 1, 1], [], []>} : vector<128x128xbf16>, vector<128x128xbf16>, vector<128x128xf32> -> vector<128x128xf32>
      %cst_19 = arith.constant 0.899999976 : f32
      %37 = vector.broadcast %cst_19 : f32 to vector<128x128xf32>
      %38 = arith.mulf %37, %36 : vector<128x128xf32>
      %39 = arith.index_cast %1 : i32 to index
      %c0_20 = arith.constant 0 : index
      %40 = vector.load %arg9[%39, %c0_20] : memref<128x128xf32, #tpu.memory_space<vmem>>, vector<128x128xf32>
      %41 = arith.addf %38, %40 : vector<128x128xf32>
      %42 = arith.index_cast %1 : i32 to index
      %c0_21 = arith.constant 0 : index
      %43 = vector.load %arg10[%42, %c0_21] : memref<128x128xf32, #tpu.memory_space<vmem>>, vector<128x128xf32>
      tpu.vector_store %arg10[%42, %c0_21], %41 {strides = array<i32>} : memref<128x128xf32, #tpu.memory_space<vmem>>, vector<128x128xf32>,
      %c9_i32 = arith.constant 9 : i32
      %44 = arith.cmpi eq, %arg0, %c9_i32 : i32
      %45 = arith.extui %44 : i1 to i32
      %c0_i32_22 = arith.constant 0 : i32
      %46 = arith.cmpi ne, %45, %c0_i32_22 : i32
      scf.if %46 {
        %47 = arith.index_cast %1 : i32 to index
        %c0_23 = arith.constant 0 : index
        %48 = vector.load %arg8[%47, %c0_23] : memref<128x128xf32, #tpu.memory_space<vmem>>, vector<128x128xf32>
        tpu.vector_store %arg8[%47, %c0_23], %41 {strides = array<i32>} : memref<128x128xf32, #tpu.memory_space<vmem>>, vector<128x128xf32>,
      } else {
      }
    } else {
    }
    return
  }
  func.func @transform_0(%arg0: i32, %arg1: i32) -> (i32, i32) {
    %c0_i32 = arith.constant 0 : i32
    %c0_i32_0 = arith.constant 0 : i32
    %c0_i32_1 = arith.constant 0 : i32
    return %c0_i32, %c0_i32_0 : i32, i32
  }
  func.func @transform_1(%arg0: i32, %arg1: i32) -> (i32, i32) {
    %c0_i32 = arith.constant 0 : i32
    %c0_i32_0 = arith.constant 0 : i32
    %c0_i32_1 = arith.constant 0 : i32
    return %c0_i32, %c0_i32_0 : i32, i32
  }
  func.func @transform_2(%arg0: i32, %arg1: i32) -> (i32, i32) {
    %c0_i32 = arith.constant 0 : i32
    %c0_i32_0 = arith.constant 0 : i32
    %c0_i32_1 = arith.constant 0 : i32
    return %c0_i32, %c0_i32_0 : i32, i32
  }
  func.func @transform_3(%arg0: i32, %arg1: i32) -> (i32, i32) {
    %c0_i32 = arith.constant 0 : i32
    %c0_i32_0 = arith.constant 0 : i32
    %c0_i32_1 = arith.constant 0 : i32
    return %c0_i32, %c0_i32_0 : i32, i32
  }
  func.func @transform_4(%arg0: i32, %arg1: i32) -> (i32, i32) {
    %c0_i32 = arith.constant 0 : i32
    %c0_i32_0 = arith.constant 0 : i32
    %c0_i32_1 = arith.constant 0 : i32
    return %c0_i32, %c0_i32_0 : i32, i32
  }
  func.func @transform_5(%arg0: i32, %arg1: i32) -> (i32, i32) {
    %c0_i32 = arith.constant 0 : i32
    %c0_i32_0 = arith.constant 0 : i32
    return %arg1, %c0_i32 : i32, i32
  }
  func.func @transform_6(%arg0: i32, %arg1: i32) -> (i32, i32) {
    %c0_i32 = arith.constant 0 : i32
    %c0_i32_0 = arith.constant 0 : i32
    %c0_i32_1 = arith.constant 0 : i32
    return %c0_i32, %c0_i32_0 : i32, i32
  }
}

</mosaic_0001>

<bundles_post_ra>
// kernel: appnp_forward.1
= control target key start
LH: loop header
LB: loop body
LE: loop exit
PB: predicated region body
PF: predicated region fallthrough
CT: control target
= control target key end

     0   :  { %s1415_s21 = smov 0   ;;  %s1417_s22 = smov 0   ;;  %s1856_s0 = inlined_call_operand.vmem [shape: bf16[128,32], index: 0, kind: input, shape index: {}]   ;;  %s1857_s1 = inlined_call_operand.vmem [shape: bf16[32,64], index: 1, kind: input, shape index: {}]   ;;  %s1858_s2 = inlined_call_operand.vmem [shape: f32[1,64], index: 2, kind: input, shape index: {}]   ;;  %s1859_s3 = inlined_call_operand.vmem [shape: bf16[64,128], index: 3, kind: input, shape index: {}]   ;;  %s1860_s4 = inlined_call_operand.vmem [shape: f32[1,128], index: 4, kind: input, shape index: {}]   ;;  %s1861_s5 = inlined_call_operand.vmem [shape: bf16[128,128], index: 5, kind: input, shape index: {}]   ;;  %s1862_s6 = inlined_call_operand.vmem [shape: f32[128,128], index: 6, kind: output, shape index: {}]  }
   0x1   :  { %s1419_s23 = smov 0  }
   0x2 LB: > { %s28_s24 = sadd.s32 1, %s1374_s22  ;;  %p1098_p0 = scmp.ge.s32.totalorder %s1378_s23, 1  ;;  %s1378_s23 = sphi %s1419_s23, %s16_s23   ;;  %s1374_s22 = sphi %s1417_s22, %s1864_s22   ;;  %s1370_s21 = sphi %s1415_s21, %s1863_s21  }
   0x3   : > { %p30_p1 = scmp.ge.s32.totalorder %s28_s24, 10  ;;  %p220_p2 = scmp.lt.s32.totalorder %s1378_s23, 11 }
   0x5   : > { %s1866_s24 = smov (%p30_p1, %s28_s24), 0  ;;  %p221_p3 = pnand %p1098_p0, %p220_p2 }
   0x6   : > { %p253_p4 = scmp.eq.s32.totalorder (!%p221_p3), %s1370_s21, 0 }
   0x7   : > { %224 = sbr.rel (%p221_p3) target bundleno = 875 (0x36b), region = 44 }
   0xc   : > { %258 = sbr.rel (!%p253_p4) target bundleno = 417 (0x1a1), region = 48  ;;  %v1255_v0 = vld [vmem:[%s1857_s1 + $0x8] sm:$0xff] (%p253_p4)  ;;  %v1254_v1 = vld [vmem:[%s1857_s1] sm:$0xff] (%p253_p4)  ;;  %vm335_vm0 = vcmask (%p253_p4), 261120   ;;  %v1248_v4 = vld [vmem:[%s1856_s0 + $0x10] sm:$0xff] (%p253_p4)  ;;  %vm469_vm1 = vcmask (%p253_p4), 523264  }
   0xd   : > { %366 = vmatpush.bf16.msra.mxu0 (%p253_p4), %v1255_v0  ;;  %1276 = vmatpush.bf16.msra.mxu3 (%p253_p4), %v1255_v0  ;;  %v1246_v2 = vld [vmem:[%s1856_s0] sm:$0xff] (%p253_p4)  ;;  %v1247_v3 = vld [vmem:[%s1856_s0 + $0x8] sm:$0xff] (%p253_p4)  ;;  %v1249_v6 = vld [vmem:[%s1856_s0 + $0x18] sm:$0xff] (%p253_p4) }
   0xe   : > { %v1251_v5 = vld [vmem:[%s1856_s0 + $0x28] sm:$0xff] (%p253_p4)  ;;  %v1252_v7 = vld [vmem:[%s1856_s0 + $0x30] sm:$0xff] (%p253_p4)  ;;  %v1250_v8 = vld [vmem:[%s1856_s0 + $0x20] sm:$0xff] (%p253_p4) }
   0xf   : > { %v1253_v9 = vld [vmem:[%s1856_s0 + $0x38] sm:$0xff] (%p253_p4)  ;;  %v1258_v11 = vld [vmem:[%s1859_s3 + $0x10] sm:$0xff] (%p253_p4)  ;;  %v1257_v12 = vld [vmem:[%s1859_s3 + $0x8] sm:$0xff] (%p253_p4) }
  0x10   : > { %v1259_v10 = vld [vmem:[%s1859_s3 + $0x18] sm:$0xff] (%p253_p4)  ;;  %v1256_v13 = vld [vmem:[%s1859_s3] sm:$0xff] (%p253_p4) }
  0x11   : > { %367 = vmatpush.bf16.msra.mxu0 %v1254_v1  ;;  %1277 = vmatpush.bf16.msra.mxu3 %v1254_v1  ;;  %v1354_v15 = vld [vmem:[%s1858_s2] ss:$0 sm:$0xff] }
  0x12   : > { %498 = vmatpush.bf16.msra.mxu1 %v1259_v10  ;;  %1278 = vmatpush.bf16.msra.mxu2 %v1259_v10 }
  0x14   : > { %1140 = vmatmul.msk.bf16.vlgmr.msra.gmra.mxu0 %vm335_vm0, %v1246_v2  ;;  %1145 = vmatmul.msk.bf16.vlgmr.msra.gmra.mxu3 %vm335_vm0, %v1251_v5 }
  0x16   : > { %499 = vmatpush.bf16.msra.mxu1 %v1258_v11  ;;  %1279 = vmatpush.bf16.msra.mxu2 %v1258_v11 }
  0x1a   : > { %500 = vmatpush.bf16.msra.mxu1 %v1257_v12  ;;  %1280 = vmatpush.bf16.msra.mxu2 %v1257_v12 }
  0x1e   : > { %501 = vmatpush.bf16.msra.mxu1 %v1256_v13  ;;  %1281 = vmatpush.bf16.msra.mxu2 %v1256_v13 }
  0x24   : > { %1141 = vmatmul.msk.bf16.gmra.mxu0 %vm335_vm0, %v1247_v3  ;;  %1146 = vmatmul.msk.bf16.gmra.mxu3 %vm335_vm0, %v1252_v7  ;;  %v1500_v7 = vld [vmem:[%s1860_s4] ss:$0 sm:$0xff] }
  0x34   : > { %1142 = vmatmul.msk.bf16.gmra.mxu0 %vm335_vm0, %v1248_v4  ;;  %1147 = vmatmul.msk.bf16.gmra.mxu3 %vm335_vm0, %v1253_v9 }
  0x44   : > { %1143 = vmatmul.msk.bf16.gmra.mxu0 %vm335_vm0, %v1249_v6 }
  0x54   : > { %1144 = vmatmul.msk.bf16.gmra.mxu0 %vm335_vm0, %v1250_v8 }
  0x91   : > { %v369_v14 = vpop.f32.mrf.mxu0 }
  0x92   : > { %v370_v16 = vadd.f32 %v1354_v15, %v369_v14 }
  0x94   : > { %v409_v19 = vmax.f32 %v370_v16, 0.0 }
  0x97   : > { %v394_v44 = vpop.f32.mrf.mxu3 }
  0x98   : > { %v395_v53 = vadd.f32 %v1354_v15, %v394_v44 }
  0x99   : > { %v371_v17 = vpop.f32.mrf.mxu0 }
  0x9a   : > { %v372_v18 = vadd.f32 %v1354_v15, %v371_v17  ;;  %v419_v55 = vmax.f32 %v395_v53, 0.0 }
  0x9c   : > { %v410_v20 = vmax.f32 %v372_v18, 0.0 }
  0x9e   : > { %v425_v21 = vpack.c.bf16 %v410_v20, %v409_v19 }
  0x9f   : > { %v396_v48 = vpop.f32.mrf.mxu3 }
  0xa0   : > { %1164 = vmatmul.msk.bf16.vlgmr.msra.gmra.mxu1 %vm469_vm1, %v425_v21  ;;  %v397_v54 = vadd.f32 %v1354_v15, %v396_v48 }
  0xa1   : > { %v374_v22 = vpop.f32.mrf.mxu0 }
  0xa2   : > { %v375_v23 = vadd.f32 %v1354_v15, %v374_v22  ;;  %v420_v56 = vmax.f32 %v397_v54, 0.0 }
  0xa4   : > { %v411_v26 = vmax.f32 %v375_v23, 0.0  ;;  %v430_v57 = vpack.c.bf16 %v420_v56, %v419_v55 }
  0xa7   : > { %v399_v52 = vpop.f32.mrf.mxu3 }
  0xa8   : > { %v400_v59 = vadd.f32 %v1354_v15, %v399_v52 }
  0xa9   : > { %v376_v24 = vpop.f32.mrf.mxu0 }
  0xaa   : > { %v377_v25 = vadd.f32 %v1354_v15, %v376_v24  ;;  %v421_v62 = vmax.f32 %v400_v59, 0.0 }
  0xac   : > { %v412_v27 = vmax.f32 %v377_v25, 0.0 }
  0xae   : > { %v426_v28 = vpack.c.bf16 %v412_v27, %v411_v26 }
  0xaf   : > { %v401_v58 = vpop.f32.mrf.mxu3 }
  0xb0   : > { %1165 = vmatmul.msk.bf16.gmra.mxu1 %vm469_vm1, %v426_v28  ;;  %v402_v60 = vadd.f32 %v1354_v15, %v401_v58 }
  0xb1   : > { %v379_v29 = vpop.f32.mrf.mxu0 }
  0xb2   : > { %v380_v30 = vadd.f32 %v1354_v15, %v379_v29  ;;  %v422_v63 = vmax.f32 %v402_v60, 0.0 }
  0xb4   : > { %v413_v33 = vmax.f32 %v380_v30, 0.0  ;;  %v431_v0 = vpack.c.bf16 %v422_v63, %v421_v62 }
  0xb7   : > { %v404_v61 = vpop.f32.mrf.mxu3 }
  0xb8   : > { %v405_v2 = vadd.f32 %v1354_v15, %v404_v61 }
  0xb9   : > { %v381_v31 = vpop.f32.mrf.mxu0 }
  0xba   : > { %v382_v32 = vadd.f32 %v1354_v15, %v381_v31  ;;  %v423_v4 = vmax.f32 %v405_v2, 0.0 }
  0xbc   : > { %v414_v34 = vmax.f32 %v382_v32, 0.0 }
  0xbe   : > { %v427_v35 = vpack.c.bf16 %v414_v34, %v413_v33 }
  0xbf   : > { %v406_v1 = vpop.f32.mrf.mxu3 }
  0xc0   : > { %1166 = vmatmul.msk.bf16.gmra.mxu1 %vm469_vm1, %v427_v35  ;;  %v407_v3 = vadd.f32 %v1354_v15, %v406_v1 }
  0xc1   : > { %v384_v36 = vpop.f32.mrf.mxu0 }
  0xc2   : > { %v385_v37 = vadd.f32 %v1354_v15, %v384_v36  ;;  %v424_v5 = vmax.f32 %v407_v3, 0.0 }
  0xc4   : > { %v415_v40 = vmax.f32 %v385_v37, 0.0  ;;  %v432_v6 = vpack.c.bf16 %v424_v5, %v423_v4 }
  0xc9   : > { %v386_v38 = vpop.f32.mrf.mxu0 }
  0xca   : > { %v387_v39 = vadd.f32 %v1354_v15, %v386_v38 }
  0xcc   : > { %v416_v41 = vmax.f32 %v387_v39, 0.0 }
  0xce   : > { %v428_v42 = vpack.c.bf16 %v416_v41, %v415_v40 }
  0xd0   : > { %1167 = vmatmul.msk.bf16.gmra.mxu1 %vm469_vm1, %v428_v42 }
  0xd1   : > { %v389_v43 = vpop.f32.mrf.mxu0 }
  0xd2   : > { %v390_v45 = vadd.f32 %v1354_v15, %v389_v43 }
  0xd4   : > { %v417_v49 = vmax.f32 %v390_v45, 0.0 }
  0xd9   : > { %v391_v46 = vpop.f32.mrf.mxu0 }
  0xda   : > { %v392_v47 = vadd.f32 %v1354_v15, %v391_v46 }
  0xdc   : > { %v418_v50 = vmax.f32 %v392_v47, 0.0 }
  0xde   : > { %v429_v51 = vpack.c.bf16 %v418_v50, %v417_v49 }
  0xe0   : > { %1168 = vmatmul.msk.bf16.vlgmr.msra.gmra.mxu2 %vm469_vm1, %v429_v51 }
  0xf0   : > { %1169 = vmatmul.msk.bf16.gmra.mxu2 %vm469_vm1, %v430_v57 }
 0x100   : > { %1170 = vmatmul.msk.bf16.gmra.mxu2 %vm469_vm1, %v431_v0 }
 0x110   : > { %1171 = vmatmul.msk.bf16.gmra.mxu2 %vm469_vm1, %v432_v6 }
 0x11d   : > { %v503_v8 = vpop.f32.mrf.mxu1 }
 0x11e   : > { %v504_v9 = vadd.f32 %v1500_v7, %v503_v8 }
 0x120   : > { %543 = vst [vmem:[#allocation3 + $0x28] sm:$0xff] %v504_v9  ;;  %v559_v10 = vmul.f32 0.1, %v504_v9 }
 0x122   : > { %575 = vst [vmem:[#allocation2 + $0x30] sm:$0xff] %v559_v10 }
 0x125   : > { %v505_v11 = vpop.f32.mrf.mxu1 }
 0x126   : > { %v506_v12 = vadd.f32 %v1500_v7, %v505_v11 }
 0x128   : > { %544 = vst [vmem:[#allocation3 + $0x68] sm:$0xff] %v506_v12  ;;  %v560_v13 = vmul.f32 0.1, %v506_v12 }
 0x12a   : > { %576 = vst [vmem:[#allocation2] sm:$0xff] %v560_v13 }
 0x12d   : > { %v508_v14 = vpop.f32.mrf.mxu1 }
 0x12e   : > { %v509_v15 = vadd.f32 %v1500_v7, %v508_v14 }
 0x130   : > { %545 = vst [vmem:[#allocation3 + $0x10] sm:$0xff] %v509_v15  ;;  %v561_v16 = vmul.f32 0.1, %v509_v15 }
 0x132   : > { %577 = vst [vmem:[#allocation2 + $0x58] sm:$0xff] %v561_v16 }
 0x135   : > { %v510_v17 = vpop.f32.mrf.mxu1 }
 0x136   : > { %v511_v18 = vadd.f32 %v1500_v7, %v510_v17 }
 0x138   : > { %546 = vst [vmem:[#allocation3 + $0x40] sm:$0xff] %v511_v18  ;;  %v562_v19 = vmul.f32 0.1, %v511_v18 }
 0x13a   : > { %578 = vst [vmem:[#allocation2 + $0x18] sm:$0xff] %v562_v19 }
 0x13d   : > { %v513_v20 = vpop.f32.mrf.mxu1 }
 0x13e   : > { %v514_v21 = vadd.f32 %v1500_v7, %v513_v20 }
 0x140   : > { %547 = vst [vmem:[#allocation3 + $0x48] sm:$0xff] %v514_v21  ;;  %v563_v22 = vmul.f32 0.1, %v514_v21 }
 0x142   : > { %579 = vst [vmem:[#allocation2 + $0x50] sm:$0xff] %v563_v22 }
 0x145   : > { %v515_v23 = vpop.f32.mrf.mxu1 }
 0x146   : > { %v516_v24 = vadd.f32 %v1500_v7, %v515_v23 }
 0x148   : > { %548 = vst [vmem:[#allocation3 + $0x30] sm:$0xff] %v516_v24  ;;  %v564_v25 = vmul.f32 0.1, %v516_v24 }
 0x14a   : > { %580 = vst [vmem:[#allocation2 + $0x68] sm:$0xff] %v564_v25 }
 0x14d   : > { %v518_v26 = vpop.f32.mrf.mxu1 }
 0x14e   : > { %v519_v27 = vadd.f32 %v1500_v7, %v518_v26 }
 0x150   : > { %549 = vst [vmem:[#allocation3 + $0x70] sm:$0xff] %v519_v27  ;;  %v565_v28 = vmul.f32 0.1, %v519_v27 }
 0x152   : > { %581 = vst [vmem:[#allocation2 + $0x8] sm:$0xff] %v565_v28 }
 0x155   : > { %v520_v29 = vpop.f32.mrf.mxu1 }
 0x156   : > { %v521_v30 = vadd.f32 %v1500_v7, %v520_v29 }
 0x158   : > { %550 = vst [vmem:[#allocation3 + $0x38] sm:$0xff] %v521_v30  ;;  %v566_v31 = vmul.f32 0.1, %v521_v30 }
 0x15a   : > { %582 = vst [vmem:[#allocation2 + $0x48] sm:$0xff] %v566_v31 }
 0x163   : > { %v523_v32 = vpop.f32.mrf.mxu2 }
 0x164   : > { %v524_v33 = vadd.f32 %v1500_v7, %v523_v32 }
 0x166   : > { %551 = vst [vmem:[#allocation3 + $0x20] sm:$0xff] %v524_v33  ;;  %v567_v34 = vmul.f32 0.1, %v524_v33 }
 0x168   : > { %583 = vst [vmem:[#allocation2 + $0x40] sm:$0xff] %v567_v34 }
 0x16b   : > { %v525_v35 = vpop.f32.mrf.mxu2 }
 0x16c   : > { %v526_v36 = vadd.f32 %v1500_v7, %v525_v35 }
 0x16e   : > { %552 = vst [vmem:[#allocation3 + $0x78] sm:$0xff] %v526_v36  ;;  %v568_v37 = vmul.f32 0.1, %v526_v36 }
 0x170   : > { %584 = vst [vmem:[#allocation2 + $0x20] sm:$0xff] %v568_v37 }
 0x173   : > { %v528_v38 = vpop.f32.mrf.mxu2 }
 0x174   : > { %v529_v39 = vadd.f32 %v1500_v7, %v528_v38 }
 0x176   : > { %553 = vst [vmem:[#allocation3 + $0x18] sm:$0xff] %v529_v39  ;;  %v569_v40 = vmul.f32 0.1, %v529_v39 }
 0x178   : > { %585 = vst [vmem:[#allocation2 + $0x10] sm:$0xff] %v569_v40 }
 0x17b   : > { %v530_v41 = vpop.f32.mrf.mxu2 }
 0x17c   : > { %v531_v42 = vadd.f32 %v1500_v7, %v530_v41 }
 0x17e   : > { %554 = vst [vmem:[#allocation3 + $0x58] sm:$0xff] %v531_v42  ;;  %v570_v43 = vmul.f32 0.1, %v531_v42 }
 0x180   : > { %586 = vst [vmem:[#allocation2 + $0x38] sm:$0xff] %v570_v43 }
 0x183   : > { %v533_v44 = vpop.f32.mrf.mxu2 }
 0x184   : > { %v534_v45 = vadd.f32 %v1500_v7, %v533_v44 }
 0x186   : > { %555 = vst [vmem:[#allocation3] sm:$0xff] %v534_v45  ;;  %v571_v46 = vmul.f32 0.1, %v534_v45 }
 0x188   : > { %587 = vst [vmem:[#allocation2 + $0x60] sm:$0xff] %v571_v46 }
 0x18b   : > { %v535_v47 = vpop.f32.mrf.mxu2 }
 0x18c   : > { %v536_v48 = vadd.f32 %v1500_v7, %v535_v47 }
 0x18e   : > { %556 = vst [vmem:[#allocation3 + $0x8] sm:$0xff] %v536_v48  ;;  %v572_v49 = vmul.f32 0.1, %v536_v48 }
 0x190   : > { %588 = vst [vmem:[#allocation2 + $0x70] sm:$0xff] %v572_v49 }
 0x193   : > { %v538_v50 = vpop.f32.mrf.mxu2 }
 0x194   : > { %v539_v51 = vadd.f32 %v1500_v7, %v538_v50 }
 0x196   : > { %557 = vst [vmem:[#allocation3 + $0x60] sm:$0xff] %v539_v51  ;;  %v573_v52 = vmul.f32 0.1, %v539_v51 }
 0x198   : > { %589 = vst [vmem:[#allocation2 + $0x78] sm:$0xff] %v573_v52 }
 0x19b   : > { %v540_v53 = vpop.f32.mrf.mxu2 }
 0x19c   : > { %v541_v54 = vadd.f32 %v1500_v7, %v540_v53 }
 0x19e   : > { %558 = vst [vmem:[#allocation3 + $0x50] sm:$0xff] %v541_v54  ;;  %v574_v55 = vmul.f32 0.1, %v541_v54 }
 0x1a0   : > { %590 = vst [vmem:[#allocation2 + $0x28] sm:$0xff] %v574_v55 }
 0x1a1 PF: > { %v1521_v56 = vld [vmem:[%s1861_s5] sm:$0xf]  ;;  %v1531_v58 = vld [vmem:[%s1861_s5] sm:$0xf0]  ;;  %v1541_v60 = vld [vmem:[%s1861_s5 + $0x8] sm:$0xf] }
 0x1a2   : > { %v1526_v57 = vld [vmem:[%s1861_s5] sm:$0xf]  ;;  %v1536_v59 = vld [vmem:[%s1861_s5] sm:$0xf0]  ;;  %v1546_v61 = vld [vmem:[%s1861_s5 + $0x8] sm:$0xf] }
 0x1a3   : > { %v1551_v62 = vld [vmem:[%s1861_s5 + $0x8] sm:$0xf0]  ;;  %v1561_v0 = vld [vmem:[%s1861_s5 + $0x10] sm:$0xf]  ;;  %v1571_v2 = vld [vmem:[%s1861_s5 + $0x10] sm:$0xf0] }
 0x1a4   : > { %v1556_v63 = vld [vmem:[%s1861_s5 + $0x8] sm:$0xf0]  ;;  %v1566_v1 = vld [vmem:[%s1861_s5 + $0x10] sm:$0xf]  ;;  %v1576_v3 = vld [vmem:[%s1861_s5 + $0x10] sm:$0xf0] }
 0x1a5   : > { %v1581_v4 = vld [vmem:[%s1861_s5 + $0x18] sm:$0xf]  ;;  %v1591_v6 = vld [vmem:[%s1861_s5 + $0x18] sm:$0xf0]  ;;  %v1601_v8 = vld [vmem:[%s1861_s5 + $0x20] sm:$0xf] }
 0x1a6   : > { %v1586_v5 = vld [vmem:[%s1861_s5 + $0x18] sm:$0xf]  ;;  %v1596_v7 = vld [vmem:[%s1861_s5 + $0x18] sm:$0xf0]  ;;  %v1606_v9 = vld [vmem:[%s1861_s5 + $0x20] sm:$0xf] }
 0x1a7   : > { %v1611_v10 = vld [vmem:[%s1861_s5 + $0x20] sm:$0xf0]  ;;  %v1621_v12 = vld [vmem:[%s1861_s5 + $0x28] sm:$0xf]  ;;  %v1631_v14 = vld [vmem:[%s1861_s5 + $0x28] sm:$0xf0] }
 0x1a8   : > { %v1616_v11 = vld [vmem:[%s1861_s5 + $0x20] sm:$0xf0]  ;;  %v1626_v13 = vld [vmem:[%s1861_s5 + $0x28] sm:$0xf]  ;;  %v1636_v15 = vld [vmem:[%s1861_s5 + $0x28] sm:$0xf0] }
 0x1a9   : > { %v1641_v16 = vld [vmem:[%s1861_s5 + $0x30] sm:$0xf]  ;;  %v1651_v18 = vld [vmem:[%s1861_s5 + $0x30] sm:$0xf0]  ;;  %v1661_v20 = vld [vmem:[%s1861_s5 + $0x38] sm:$0xf] }
 0x1aa   : > { %v1646_v17 = vld [vmem:[%s1861_s5 + $0x30] sm:$0xf]  ;;  %v1656_v19 = vld [vmem:[%s1861_s5 + $0x30] sm:$0xf0]  ;;  %v1666_v21 = vld [vmem:[%s1861_s5 + $0x38] sm:$0xf] }
 0x1ab   : > { %v1671_v22 = vld [vmem:[%s1861_s5 + $0x38] sm:$0xf0]  ;;  %p607_p5 = scmp.lt.s32.totalorder %s1370_s21, 0  ;;  %s608_s17 = ssub.s32 0, %s1370_s21 }
 0x1ac   : > { %v1676_v23 = vld [vmem:[%s1861_s5 + $0x38] sm:$0xf0]  ;;  %s1172_s18 = smin.u32 %s1370_s21, %s608_s17 }
 0x1ad   : > { %s610_s19 = sand.u32 1, %s1172_s18  }
 0x1ae   : > { %s611_s20 = ssub.s32 0, %s610_s19 }
 0x1af   : > { %s1868_s20 = smov (!%p607_p5, %s611_s20), %s610_s19 }
 0x1b0   : > { %p1174_p6 = scmp.lt.s32.totalorder %s1868_s20, 0  ;;  %s617_s25 = sadd.s32 2, %s1868_s20 }
 0x1b2   : > { %s1870_s25 = smov (!%p1174_p6, %s617_s25), %s1868_s20 }
 0x1b3   : > { %p1175_p7 = scmp.ne.s32.totalorder %s1870_s25, 0 }
 0x1b4   : > { %p1208_p8 = scmp.ne.s32.totalorder (!%p1175_p7), %s1370_s21, 9 }
 0x1b5   : > { %622 = sbr.rel (%p1175_p7) target bundleno = 655 (0x28f), region = 52 }
 0x1ba   : > { %v637_v24 = vld [vmem:[#allocation3 + $0x60] sm:$0xff]  ;;  %v638_v25 = vld [vmem:[#allocation3 + $0x50] sm:$0xff]  ;;  %v636_v28 = vld [vmem:[#allocation3 + $0x8] sm:$0xff]  ;;  %v1179_v48 = vor.u32 %v1536_v59, %v1526_v57  ;;  %v1187_v49 = vor.u32 %v1576_v3, %v1566_v1  ;;  %v1195_v50 = vor.u32 %v1616_v11, %v1606_v9  ;;  %v1203_v51 = vor.u32 %v1656_v19, %v1646_v17 }
 0x1bb   : > { %v635_v26 = vld [vmem:[#allocation3] sm:$0xff]  ;;  %v646_v27 = vpack.c.bf16 %v638_v25, %v637_v24  ;;  %v633_v30 = vld [vmem:[#allocation3 + $0x18] sm:$0xff]  ;;  %v629_v36 = vld [vmem:[#allocation3 + $0x70] sm:$0xff]  ;;  %v1183_v52 = vor.u32 %v1556_v63, %v1546_v61  ;;  %v1191_v53 = vor.u32 %v1596_v7, %v1586_v5  ;;  %v1199_v54 = vor.u32 %v1636_v15, %v1626_v13 }
 0x1bc   : > { %v645_v29 = vpack.c.bf16 %v636_v28, %v635_v26  ;;  %v634_v31 = vld [vmem:[#allocation3 + $0x58] sm:$0xff]  ;;  %v631_v33 = vld [vmem:[#allocation3 + $0x20] sm:$0xff]  ;;  %v627_v39 = vld [vmem:[#allocation3 + $0x48] sm:$0xff]  ;;  %v1207_v55 = vor.u32 %v1676_v23, %v1666_v21 }
 0x1bd   : > { %695 = vmatpush.bf16.msra.mxu0 %v646_v27  ;;  %1282 = vmatpush.bf16.msra.mxu1 %v646_v27  ;;  %v644_v32 = vpack.c.bf16 %v634_v31, %v633_v30  ;;  %v632_v34 = vld [vmem:[#allocation3 + $0x78] sm:$0xff]  ;;  %v628_v40 = vld [vmem:[#allocation3 + $0x30] sm:$0xff]  ;;  %v626_v43 = vld [vmem:[#allocation3 + $0x40] sm:$0xff] }
 0x1be   : > { %1283 = vmatpush.bf16.msra.mxu2 %v646_v27  ;;  %1284 = vmatpush.bf16.msra.mxu3 %v646_v27  ;;  %v643_v35 = vpack.c.bf16 %v632_v34, %v631_v33  ;;  %v630_v37 = vld [vmem:[#allocation3 + $0x38] sm:$0xff]  ;;  %v641_v41 = vpack.c.bf16 %v628_v40, %v627_v39  ;;  %v625_v42 = vld [vmem:[#allocation3 + $0x10] sm:$0xff]  ;;  %v623_v45 = vld [vmem:[#allocation3 + $0x28] sm:$0xff] }
 0x1bf   : > { %v642_v38 = vpack.c.bf16 %v630_v37, %v629_v36  ;;  %v640_v44 = vpack.c.bf16 %v626_v43, %v625_v42  ;;  %v624_v46 = vld [vmem:[#allocation3 + $0x68] sm:$0xff]  ;;  %v761_v59 = vld [vmem:[#allocation2 + $0x30] sm:$0xff]  ;;  %v769_v7 = vld [vmem:[#allocation2 + $0x40] sm:$0xff] }
 0x1c0   : > { %v639_v47 = vpack.c.bf16 %v624_v46, %v623_v45  ;;  %v765_v3 = vld [vmem:[#allocation2 + $0x50] sm:$0xff]  ;;  %v773_v15 = vld [vmem:[#allocation2 + $0x60] sm:$0xff]  ;;  %v766_v25 = vld [vmem:[#allocation2 + $0x68] sm:$0xff] }
 0x1c1   : > { %696 = vmatpush.bf16.msra.mxu0 %v645_v29  ;;  %1285 = vmatpush.bf16.msra.mxu1 %v645_v29  ;;  %v762_v23 = vld [vmem:[#allocation2] sm:$0xff]  ;;  %v763_v39 = vld [vmem:[#allocation2 + $0x58] sm:$0xff] }
 0x1c2   : > { %1286 = vmatpush.bf16.msra.mxu2 %v645_v29  ;;  %1287 = vmatpush.bf16.msra.mxu3 %v645_v29  ;;  %v770_v33 = vld [vmem:[#allocation2 + $0x20] sm:$0xff] }
 0x1c5   : > { %697 = vmatpush.bf16.msra.mxu0 %v644_v32  ;;  %1288 = vmatpush.bf16.msra.mxu1 %v644_v32 }
 0x1c6   : > { %1289 = vmatpush.bf16.msra.mxu2 %v644_v32  ;;  %1290 = vmatpush.bf16.msra.mxu3 %v644_v32 }
 0x1c9   : > { %698 = vmatpush.bf16.msra.mxu0 %v643_v35  ;;  %1291 = vmatpush.bf16.msra.mxu1 %v643_v35 }
 0x1ca   : > { %1292 = vmatpush.bf16.msra.mxu2 %v643_v35  ;;  %1293 = vmatpush.bf16.msra.mxu3 %v643_v35  ;;  %v774_v35 = vld [vmem:[#allocation2 + $0x70] sm:$0xff] }
 0x1cd   : > { %699 = vmatpush.bf16.msra.mxu0 %v642_v38  ;;  %1294 = vmatpush.bf16.msra.mxu1 %v642_v38 }
 0x1ce   : > { %1295 = vmatpush.bf16.msra.mxu2 %v642_v38  ;;  %1296 = vmatpush.bf16.msra.mxu3 %v642_v38 }
 0x1d1   : > { %700 = vmatpush.bf16.msra.mxu0 %v641_v41  ;;  %1297 = vmatpush.bf16.msra.mxu1 %v641_v41 }
 0x1d2   : > { %1298 = vmatpush.bf16.msra.mxu2 %v641_v41  ;;  %1299 = vmatpush.bf16.msra.mxu3 %v641_v41  ;;  %v767_v41 = vld [vmem:[#allocation2 + $0x8] sm:$0xff] }
 0x1d5   : > { %701 = vmatpush.bf16.msra.mxu0 %v640_v44  ;;  %1300 = vmatpush.bf16.msra.mxu1 %v640_v44 }
 0x1d6   : > { %1301 = vmatpush.bf16.msra.mxu2 %v640_v44  ;;  %1302 = vmatpush.bf16.msra.mxu3 %v640_v44 }
 0x1d9   : > { %702 = vmatpush.bf16.msra.mxu0 %v639_v47  ;;  %1303 = vmatpush.bf16.msra.mxu1 %v639_v47 }
 0x1da   : > { %1304 = vmatpush.bf16.msra.mxu2 %v639_v47  ;;  %1305 = vmatpush.bf16.msra.mxu3 %v639_v47 }
 0x1dc   : > { %703 = vmatmul.bf16.vlgmr.msra.gmra.mxu0 %v1179_v48  ;;  %713 = vmatmul.bf16.vlgmr.msra.gmra.mxu1 %v1187_v49  ;;  %v771_v49 = vld [vmem:[#allocation2 + $0x10] sm:$0xff] }
 0x1dd   : > { %723 = vmatmul.bf16.vlgmr.msra.gmra.mxu2 %v1195_v50  ;;  %733 = vmatmul.bf16.vlgmr.msra.gmra.mxu3 %v1203_v51  ;;  %v775_v51 = vld [vmem:[#allocation2 + $0x78] sm:$0xff] }
 0x1ec   : > { %708 = vmatmul.bf16.gmra.mxu0 %v1183_v52  ;;  %718 = vmatmul.bf16.gmra.mxu1 %v1191_v53 }
 0x1ed   : > { %728 = vmatmul.bf16.gmra.mxu2 %v1199_v54  ;;  %738 = vmatmul.bf16.gmra.mxu3 %v1207_v55  ;;  %v764_v55 = vld [vmem:[#allocation2 + $0x18] sm:$0xff] }
 0x259   : > { %v704_v57 = vpop.f32.mrf.mxu0  ;;  %v714_v1 = vpop.f32.mrf.mxu1 }
 0x25a   : > { %v744_v9 = vmul.f32 0.9, %v704_v57  ;;  %v748_v11 = vmul.f32 0.9, %v714_v1 }
 0x25c   : > { %v1700_v61 = vadd.f32 %v761_v59, %v744_v9  ;;  %v1702_v63 = vadd.f32 %v765_v3, %v748_v11  ;;  %v768_v59 = vld [vmem:[#allocation2 + $0x48] sm:$0xff] }
 0x25e   : > { %794 = vst [vmem:[#allocation4 + $0x8] sm:$0xff] %v1700_v61 }
 0x25f   : > { %798 = vst [vmem:[#allocation4 + $0x68] sm:$0xff] %v1702_v63 }
 0x260   : > { %v724_v5 = vpop.f32.mrf.mxu2  ;;  %v734_v13 = vpop.f32.mrf.mxu3 }
 0x261   : > { %v752_v17 = vmul.f32 0.9, %v724_v5  ;;  %v756_v19 = vmul.f32 0.9, %v734_v13  ;;  %v706_v21 = vpop.f32.mrf.mxu0  ;;  %v716_v24 = vpop.f32.mrf.mxu1 }
 0x262   : > { %v745_v26 = vmul.f32 0.9, %v706_v21  ;;  %v749_v27 = vmul.f32 0.9, %v716_v24 }
 0x263   : > { %v1706_v28 = vadd.f32 %v769_v7, %v752_v17  ;;  %v1708_v29 = vadd.f32 %v773_v15, %v756_v19  ;;  %v772_v15 = vld [vmem:[#allocation2 + $0x38] sm:$0xff]  ;;  %v776_v19 = vld [vmem:[#allocation2 + $0x28] sm:$0xff] }
 0x264   : > { %v778_v30 = vadd.f32 %v762_v23, %v745_v26  ;;  %v782_v31 = vadd.f32 %v766_v25, %v749_v27 }
 0x265   : > { %802 = vst [vmem:[#allocation4 + $0x40] sm:$0xff] %v1706_v28 }
 0x266   : > { %806 = vst [vmem:[#allocation4 + $0x58] sm:$0xff] %v1708_v29 }
 0x267   : > { %795 = vst [vmem:[#allocation4] sm:$0xff] %v778_v30 }
 0x268   : > { %799 = vst [vmem:[#allocation4 + $0x18] sm:$0xff] %v782_v31  ;;  %v726_v32 = vpop.f32.mrf.mxu2  ;;  %v736_v34 = vpop.f32.mrf.mxu3 }
 0x269   : > { %v753_v36 = vmul.f32 0.9, %v726_v32  ;;  %v757_v37 = vmul.f32 0.9, %v736_v34  ;;  %v709_v38 = vpop.f32.mrf.mxu0  ;;  %v719_v40 = vpop.f32.mrf.mxu1 }
 0x26a   : > { %v746_v42 = vmul.f32 0.9, %v709_v38  ;;  %v750_v43 = vmul.f32 0.9, %v719_v40 }
 0x26b   : > { %v786_v44 = vadd.f32 %v770_v33, %v753_v36  ;;  %v790_v45 = vadd.f32 %v774_v35, %v757_v37 }
 0x26c   : > { %v779_v46 = vadd.f32 %v763_v39, %v746_v42  ;;  %v783_v47 = vadd.f32 %v767_v41, %v750_v43 }
 0x26d   : > { %803 = vst [vmem:[#allocation4 + $0x28] sm:$0xff] %v786_v44 }
 0x26e   : > { %807 = vst [vmem:[#allocation4 + $0x30] sm:$0xff] %v790_v45 }
 0x26f   : > { %796 = vst [vmem:[#allocation4 + $0x48] sm:$0xff] %v779_v46 }
 0x270   : > { %800 = vst [vmem:[#allocation4 + $0x10] sm:$0xff] %v783_v47  ;;  %v729_v48 = vpop.f32.mrf.mxu2  ;;  %v739_v50 = vpop.f32.mrf.mxu3 }
 0x271   : > { %v754_v52 = vmul.f32 0.9, %v729_v48  ;;  %v758_v53 = vmul.f32 0.9, %v739_v50  ;;  %v711_v54 = vpop.f32.mrf.mxu0  ;;  %v721_v57 = vpop.f32.mrf.mxu1 }
 0x272   : > { %v747_v1 = vmul.f32 0.9, %v711_v54  ;;  %v751_v3 = vmul.f32 0.9, %v721_v57 }
 0x273   : > { %v787_v9 = vadd.f32 %v771_v49, %v754_v52  ;;  %v791_v11 = vadd.f32 %v775_v51, %v758_v53 }
 0x274   : > { %v780_v5 = vadd.f32 %v764_v55, %v747_v1  ;;  %v784_v7 = vadd.f32 %v768_v59, %v751_v3 }
 0x275   : > { %804 = vst [vmem:[#allocation4 + $0x70] sm:$0xff] %v787_v9 }
 0x276   : > { %808 = vst [vmem:[#allocation4 + $0x50] sm:$0xff] %v791_v11 }
 0x277   : > { %797 = vst [vmem:[#allocation4 + $0x60] sm:$0xff] %v780_v5 }
 0x278   : > { %801 = vst [vmem:[#allocation4 + $0x38] sm:$0xff] %v784_v7  ;;  %v731_v13 = vpop.f32.mrf.mxu2  ;;  %v741_v17 = vpop.f32.mrf.mxu3 }
 0x279   : > { %v755_v21 = vmul.f32 0.9, %v731_v13  ;;  %v759_v23 = vmul.f32 0.9, %v741_v17 }
 0x27a   : > { %813 = sbr.rel (%p1208_p8) target bundleno = 655 (0x28f), region = 56 }
 0x27b   : > { %v788_v24 = vadd.f32 %v772_v15, %v755_v21  ;;  %v792_v25 = vadd.f32 %v776_v19, %v759_v23 }
 0x27d   : > { %805 = vst [vmem:[#allocation4 + $0x20] sm:$0xff] %v788_v24 }
 0x27e   : > { %809 = vst [vmem:[#allocation4 + $0x78] sm:$0xff] %v792_v25 }
 0x27f   : > { %815 = vst [vmem:[%s1862_s6] sm:$0xff] %v1700_v61 }
 0x280   : > { %816 = vst [vmem:[%s1862_s6 + $0x8] sm:$0xff] %v778_v30 }
 0x281   : > { %817 = vst [vmem:[%s1862_s6 + $0x10] sm:$0xff] %v779_v46 }
 0x282   : > { %818 = vst [vmem:[%s1862_s6 + $0x18] sm:$0xff] %v780_v5 }
 0x283   : > { %819 = vst [vmem:[%s1862_s6 + $0x20] sm:$0xff] %v1702_v63 }
 0x284   : > { %820 = vst [vmem:[%s1862_s6 + $0x28] sm:$0xff] %v782_v31 }
 0x285   : > { %821 = vst [vmem:[%s1862_s6 + $0x30] sm:$0xff] %v783_v47 }
 0x286   : > { %822 = vst [vmem:[%s1862_s6 + $0x38] sm:$0xff] %v784_v7 }
 0x287   : > { %823 = vst [vmem:[%s1862_s6 + $0x40] sm:$0xff] %v1706_v28 }
 0x288   : > { %824 = vst [vmem:[%s1862_s6 + $0x48] sm:$0xff] %v786_v44 }
 0x289   : > { %825 = vst [vmem:[%s1862_s6 + $0x50] sm:$0xff] %v787_v9 }
 0x28a   : > { %826 = vst [vmem:[%s1862_s6 + $0x58] sm:$0xff] %v788_v24 }
 0x28b   : > { %827 = vst [vmem:[%s1862_s6 + $0x60] sm:$0xff] %v1708_v29 }
 0x28c   : > { %828 = vst [vmem:[%s1862_s6 + $0x68] sm:$0xff] %v790_v45 }
 0x28d   : > { %829 = vst [vmem:[%s1862_s6 + $0x70] sm:$0xff] %v791_v11 }
 0x28e   : > { %830 = vst [vmem:[%s1862_s6 + $0x78] sm:$0xff] %v792_v25 }
 0x28f PF: > { %p1209_p9 = scmp.ne.s32.totalorder %s1870_s25, 1 }
 0x290   : > { %p1242_p10 = scmp.ne.s32.totalorder (!%p1209_p9), %s1370_s21, 9 }
 0x291   : > { %834 = sbr.rel (%p1209_p9) target bundleno = 875 (0x36b), region = 60 }
 0x296   : > { %v849_v61 = vld [vmem:[#allocation4 + $0x50] sm:$0xff]  ;;  %v850_v63 = vld [vmem:[#allocation4 + $0x78] sm:$0xff]  ;;  %v846_v31 = vld [vmem:[#allocation4 + $0x20] sm:$0xff]  ;;  %v1213_v48 = vor.u32 %v1531_v58, %v1521_v56  ;;  %v1221_v49 = vor.u32 %v1571_v2, %v1561_v0  ;;  %v1229_v50 = vor.u32 %v1611_v10, %v1601_v8  ;;  %v1237_v51 = vor.u32 %v1651_v18, %v1641_v16 }
 0x297   : > { %v847_v26 = vld [vmem:[#allocation4 + $0x58] sm:$0xff]  ;;  %v858_v27 = vpack.c.bf16 %v850_v63, %v849_v61  ;;  %v848_v28 = vld [vmem:[#allocation4 + $0x30] sm:$0xff]  ;;  %v843_v33 = vld [vmem:[#allocation4 + $0x40] sm:$0xff]  ;;  %v1217_v56 = vor.u32 %v1551_v62, %v1541_v60  ;;  %v1225_v58 = vor.u32 %v1591_v6, %v1581_v4  ;;  %v1233_v0 = vor.u32 %v1631_v14, %v1621_v12 }
 0x298   : > { %v857_v29 = vpack.c.bf16 %v848_v28, %v847_v26  ;;  %v845_v30 = vld [vmem:[#allocation4 + $0x70] sm:$0xff]  ;;  %v844_v34 = vld [vmem:[#allocation4 + $0x28] sm:$0xff]  ;;  %v842_v37 = vld [vmem:[#allocation4 + $0x38] sm:$0xff]  ;;  %v1241_v2 = vor.u32 %v1671_v22, %v1661_v20 }
 0x299   : > { %907 = vmatpush.bf16.msra.mxu0 %v858_v27  ;;  %1306 = vmatpush.bf16.msra.mxu1 %v858_v27  ;;  %v856_v32 = vpack.c.bf16 %v846_v31, %v845_v30  ;;  %v855_v35 = vpack.c.bf16 %v844_v34, %v843_v33  ;;  %v841_v36 = vld [vmem:[#allocation4 + $0x10] sm:$0xff]  ;;  %v839_v39 = vld [vmem:[#allocation4 + $0x68] sm:$0xff]  ;;  %v840_v40 = vld [vmem:[#allocation4 + $0x18] sm:$0xff] }
 0x29a   : > { %1307 = vmatpush.bf16.msra.mxu2 %v858_v27  ;;  %1308 = vmatpush.bf16.msra.mxu3 %v858_v27  ;;  %v854_v38 = vpack.c.bf16 %v842_v37, %v841_v36  ;;  %v853_v41 = vpack.c.bf16 %v840_v40, %v839_v39  ;;  %v837_v42 = vld [vmem:[#allocation4 + $0x48] sm:$0xff]  ;;  %v838_v43 = vld [vmem:[#allocation4 + $0x60] sm:$0xff]  ;;  %v973_v10 = vld [vmem:[#allocation2 + $0x30] sm:$0xff] }
 0x29b   : > { %v852_v44 = vpack.c.bf16 %v838_v43, %v837_v42  ;;  %v835_v45 = vld [vmem:[#allocation4 + $0x8] sm:$0xff]  ;;  %v836_v46 = vld [vmem:[#allocation4] sm:$0xff]  ;;  %v977_v18 = vld [vmem:[#allocation2 + $0x50] sm:$0xff] }
 0x29c   : > { %v851_v47 = vpack.c.bf16 %v836_v46, %v835_v45  ;;  %v981_v6 = vld [vmem:[#allocation2 + $0x40] sm:$0xff]  ;;  %v978_v59 = vld [vmem:[#allocation2 + $0x68] sm:$0xff]  ;;  %v986_v19 = vld [vmem:[#allocation2 + $0x70] sm:$0xff] }
 0x29d   : > { %908 = vmatpush.bf16.msra.mxu0 %v857_v29  ;;  %1309 = vmatpush.bf16.msra.mxu1 %v857_v29  ;;  %v985_v14 = vld [vmem:[#allocation2 + $0x60] sm:$0xff]  ;;  %v975_v25 = vld [vmem:[#allocation2 + $0x58] sm:$0xff]  ;;  %v979_v63 = vld [vmem:[#allocation2 + $0x8] sm:$0xff] }
 0x29e   : > { %1310 = vmatpush.bf16.msra.mxu2 %v857_v29  ;;  %1311 = vmatpush.bf16.msra.mxu3 %v857_v29  ;;  %v974_v55 = vld [vmem:[#allocation2] sm:$0xff]  ;;  %v983_v33 = vld [vmem:[#allocation2 + $0x10] sm:$0xff]  ;;  %v976_v39 = vld [vmem:[#allocation2 + $0x18] sm:$0xff] }
 0x29f   : > { %v982_v15 = vld [vmem:[#allocation2 + $0x20] sm:$0xff] }
 0x2a1   : > { %909 = vmatpush.bf16.msra.mxu0 %v856_v32  ;;  %1312 = vmatpush.bf16.msra.mxu1 %v856_v32 }
 0x2a2   : > { %1313 = vmatpush.bf16.msra.mxu2 %v856_v32  ;;  %1314 = vmatpush.bf16.msra.mxu3 %v856_v32 }
 0x2a5   : > { %910 = vmatpush.bf16.msra.mxu0 %v855_v35  ;;  %1315 = vmatpush.bf16.msra.mxu1 %v855_v35 }
 0x2a6   : > { %1316 = vmatpush.bf16.msra.mxu2 %v855_v35  ;;  %1317 = vmatpush.bf16.msra.mxu3 %v855_v35  ;;  %v987_v35 = vld [vmem:[#allocation2 + $0x78] sm:$0xff] }
 0x2a9   : > { %911 = vmatpush.bf16.msra.mxu0 %v854_v38  ;;  %1318 = vmatpush.bf16.msra.mxu1 %v854_v38 }
 0x2aa   : > { %1319 = vmatpush.bf16.msra.mxu2 %v854_v38  ;;  %1320 = vmatpush.bf16.msra.mxu3 %v854_v38 }
 0x2ad   : > { %912 = vmatpush.bf16.msra.mxu0 %v853_v41  ;;  %1321 = vmatpush.bf16.msra.mxu1 %v853_v41 }
 0x2ae   : > { %1322 = vmatpush.bf16.msra.mxu2 %v853_v41  ;;  %1323 = vmatpush.bf16.msra.mxu3 %v853_v41  ;;  %v980_v41 = vld [vmem:[#allocation2 + $0x48] sm:$0xff] }
 0x2b1   : > { %913 = vmatpush.bf16.msra.mxu0 %v852_v44  ;;  %1324 = vmatpush.bf16.msra.mxu1 %v852_v44 }
 0x2b2   : > { %1325 = vmatpush.bf16.msra.mxu2 %v852_v44  ;;  %1326 = vmatpush.bf16.msra.mxu3 %v852_v44 }
 0x2b5   : > { %914 = vmatpush.bf16.msra.mxu0 %v851_v47  ;;  %1327 = vmatpush.bf16.msra.mxu1 %v851_v47 }
 0x2b6   : > { %1328 = vmatpush.bf16.msra.mxu2 %v851_v47  ;;  %1329 = vmatpush.bf16.msra.mxu3 %v851_v47 }
 0x2b8   : > { %915 = vmatmul.bf16.vlgmr.msra.gmra.mxu0 %v1213_v48  ;;  %925 = vmatmul.bf16.vlgmr.msra.gmra.mxu1 %v1221_v49  ;;  %v984_v49 = vld [vmem:[#allocation2 + $0x38] sm:$0xff] }
 0x2b9   : > { %935 = vmatmul.bf16.vlgmr.msra.gmra.mxu2 %v1229_v50  ;;  %945 = vmatmul.bf16.vlgmr.msra.gmra.mxu3 %v1237_v51  ;;  %v988_v51 = vld [vmem:[#allocation2 + $0x28] sm:$0xff] }
 0x2c8   : > { %920 = vmatmul.bf16.gmra.mxu0 %v1217_v56  ;;  %930 = vmatmul.bf16.gmra.mxu1 %v1225_v58 }
 0x2c9   : > { %940 = vmatmul.bf16.gmra.mxu2 %v1233_v0  ;;  %950 = vmatmul.bf16.gmra.mxu3 %v1241_v2 }
 0x335   : > { %v916_v8 = vpop.f32.mrf.mxu0  ;;  %v926_v16 = vpop.f32.mrf.mxu1 }
 0x336   : > { %v956_v52 = vmul.f32 0.9, %v916_v8  ;;  %v960_v53 = vmul.f32 0.9, %v926_v16 }
 0x338   : > { %v1782_v60 = vadd.f32 %v973_v10, %v956_v52  ;;  %v1784_v62 = vadd.f32 %v977_v18, %v960_v53 }
 0x33a   : > { %1006 = vst [vmem:[#allocation3 + $0x28] sm:$0xff] %v1782_v60 }
 0x33b   : > { %1010 = vst [vmem:[#allocation3 + $0x48] sm:$0xff] %v1784_v62 }
 0x33c   : > { %v936_v4 = vpop.f32.mrf.mxu2  ;;  %v946_v12 = vpop.f32.mrf.mxu3 }
 0x33d   : > { %v964_v20 = vmul.f32 0.9, %v936_v4  ;;  %v968_v22 = vmul.f32 0.9, %v946_v12  ;;  %v918_v54 = vpop.f32.mrf.mxu0  ;;  %v928_v57 = vpop.f32.mrf.mxu1 }
 0x33e   : > { %v957_v1 = vmul.f32 0.9, %v918_v54  ;;  %v961_v3 = vmul.f32 0.9, %v928_v57 }
 0x33f   : > { %v1788_v9 = vadd.f32 %v981_v6, %v964_v20  ;;  %v1790_v11 = vadd.f32 %v985_v14, %v968_v22 }
 0x340   : > { %v990_v5 = vadd.f32 %v974_v55, %v957_v1  ;;  %v994_v7 = vadd.f32 %v978_v59, %v961_v3 }
 0x341   : > { %1014 = vst [vmem:[#allocation3 + $0x20] sm:$0xff] %v1788_v9 }
 0x342   : > { %1018 = vst [vmem:[#allocation3] sm:$0xff] %v1790_v11 }
 0x343   : > { %1007 = vst [vmem:[#allocation3 + $0x68] sm:$0xff] %v990_v5 }
 0x344   : > { %1011 = vst [vmem:[#allocation3 + $0x30] sm:$0xff] %v994_v7  ;;  %v938_v13 = vpop.f32.mrf.mxu2  ;;  %v948_v17 = vpop.f32.mrf.mxu3 }
 0x345   : > { %v965_v21 = vmul.f32 0.9, %v938_v13  ;;  %v969_v23 = vmul.f32 0.9, %v948_v17  ;;  %v921_v24 = vpop.f32.mrf.mxu0  ;;  %v931_v61 = vpop.f32.mrf.mxu1 }
 0x346   : > { %v958_v26 = vmul.f32 0.9, %v921_v24  ;;  %v962_v27 = vmul.f32 0.9, %v931_v61 }
 0x347   : > { %v998_v28 = vadd.f32 %v982_v15, %v965_v21  ;;  %v1002_v29 = vadd.f32 %v986_v19, %v969_v23 }
 0x348   : > { %v991_v30 = vadd.f32 %v975_v25, %v958_v26  ;;  %v995_v31 = vadd.f32 %v979_v63, %v962_v27 }
 0x349   : > { %1015 = vst [vmem:[#allocation3 + $0x78] sm:$0xff] %v998_v28 }
 0x34a   : > { %1019 = vst [vmem:[#allocation3 + $0x8] sm:$0xff] %v1002_v29 }
 0x34b   : > { %1008 = vst [vmem:[#allocation3 + $0x10] sm:$0xff] %v991_v30 }
 0x34c   : > { %1012 = vst [vmem:[#allocation3 + $0x70] sm:$0xff] %v995_v31  ;;  %v941_v32 = vpop.f32.mrf.mxu2  ;;  %v951_v34 = vpop.f32.mrf.mxu3 }
 0x34d   : > { %v966_v36 = vmul.f32 0.9, %v941_v32  ;;  %v970_v37 = vmul.f32 0.9, %v951_v34  ;;  %v923_v38 = vpop.f32.mrf.mxu0  ;;  %v933_v40 = vpop.f32.mrf.mxu1 }
 0x34e   : > { %v959_v42 = vmul.f32 0.9, %v923_v38  ;;  %v963_v43 = vmul.f32 0.9, %v933_v40 }
 0x34f   : > { %v999_v44 = vadd.f32 %v983_v33, %v966_v36  ;;  %v1003_v45 = vadd.f32 %v987_v35, %v970_v37 }
 0x350   : > { %v992_v46 = vadd.f32 %v976_v39, %v959_v42  ;;  %v996_v47 = vadd.f32 %v980_v41, %v963_v43 }
 0x351   : > { %1016 = vst [vmem:[#allocation3 + $0x18] sm:$0xff] %v999_v44 }
 0x352   : > { %1020 = vst [vmem:[#allocation3 + $0x60] sm:$0xff] %v1003_v45 }
 0x353   : > { %1009 = vst [vmem:[#allocation3 + $0x40] sm:$0xff] %v992_v46 }
 0x354   : > { %1013 = vst [vmem:[#allocation3 + $0x38] sm:$0xff] %v996_v47  ;;  %v943_v48 = vpop.f32.mrf.mxu2  ;;  %v953_v50 = vpop.f32.mrf.mxu3 }
 0x355   : > { %v967_v56 = vmul.f32 0.9, %v943_v48  ;;  %v971_v58 = vmul.f32 0.9, %v953_v50 }
 0x356   : > { %1025 = sbr.rel (%p1242_p10) target bundleno = 875 (0x36b), region = 64 }
 0x357   : > { %v1000_v0 = vadd.f32 %v984_v49, %v967_v56  ;;  %v1004_v2 = vadd.f32 %v988_v51, %v971_v58 }
 0x359   : > { %1017 = vst [vmem:[#allocation3 + $0x58] sm:$0xff] %v1000_v0 }
 0x35a   : > { %1021 = vst [vmem:[#allocation3 + $0x50] sm:$0xff] %v1004_v2 }
 0x35b   : > { %1027 = vst [vmem:[%s1862_s6] sm:$0xff] %v1782_v60 }
 0x35c   : > { %1028 = vst [vmem:[%s1862_s6 + $0x8] sm:$0xff] %v990_v5 }
 0x35d   : > { %1029 = vst [vmem:[%s1862_s6 + $0x10] sm:$0xff] %v991_v30 }
 0x35e   : > { %1030 = vst [vmem:[%s1862_s6 + $0x18] sm:$0xff] %v992_v46 }
 0x35f   : > { %1031 = vst [vmem:[%s1862_s6 + $0x20] sm:$0xff] %v1784_v62 }
 0x360   : > { %1032 = vst [vmem:[%s1862_s6 + $0x28] sm:$0xff] %v994_v7 }
 0x361   : > { %1033 = vst [vmem:[%s1862_s6 + $0x30] sm:$0xff] %v995_v31 }
 0x362   : > { %1034 = vst [vmem:[%s1862_s6 + $0x38] sm:$0xff] %v996_v47 }
 0x363   : > { %1035 = vst [vmem:[%s1862_s6 + $0x40] sm:$0xff] %v1788_v9 }
 0x364   : > { %1036 = vst [vmem:[%s1862_s6 + $0x48] sm:$0xff] %v998_v28 }
 0x365   : > { %1037 = vst [vmem:[%s1862_s6 + $0x50] sm:$0xff] %v999_v44 }
 0x366   : > { %1038 = vst [vmem:[%s1862_s6 + $0x58] sm:$0xff] %v1000_v0 }
 0x367   : > { %1039 = vst [vmem:[%s1862_s6 + $0x60] sm:$0xff] %v1790_v11 }
 0x368   : > { %1040 = vst [vmem:[%s1862_s6 + $0x68] sm:$0xff] %v1002_v29 }
 0x369   : > { %1041 = vst [vmem:[%s1862_s6 + $0x70] sm:$0xff] %v1003_v45 }
 0x36a   : > { %1042 = vst [vmem:[%s1862_s6 + $0x78] sm:$0xff] %v1004_v2 }
 0x36b PF: > { %s16_s23 = sadd.s32 1, %s1378_s23   ;;  %s1863_s21 = smov %s1374_s22 }
 0x36c   : > { %p13_p11 = scmp.ge.s32.totalorder %s16_s23, 12   ;;  %s1864_s22 = smov %s1866_s24 }
 0x36e   :  { %15 = sbr.rel (!%p13_p11) target bundleno = 2 (0x2), region = 96 }

</bundles_post_ra>
